<compile_context>
chip_gen: v7x
topology: tpu7x:2x2x1
jax: 0.10.0
libtpu: 0.0.40
codegen_flags: <defaults>
</compile_context>

<pallas_src>
import functools
import math

import jax
import jax.numpy as jnp
import numpy as np
from jax.experimental import pallas as pl
from jax.experimental.pallas import tpu as pltpu


# Above the 16/32 MiB scoped defaults (v5e / v6e,v7x), below v7x 64 MiB physical.
_VMEM_LIMIT = 48 * 1024 * 1024


def _fit_tile(dim, target, align):
    """Largest tile <= target that divides `dim` and is a multiple of `align`.
    Falls back to the full dimension (a full-extent block is always legal)."""
    # TODO(synk): pad + mask awkward (non-tileable) lengths instead of falling
    # back to a full-extent block, which can inflate VMEM for odd shapes.
    if dim <= target:
        return dim
    t = (target // align) * align
    while t >= align:
        if dim % t == 0:
            return t
        t -= align
    return dim


# ---------------------------------------------------------------------------
# Tiled linear: o = x @ W + b   (bf16 MXU inputs, f32 accumulation)
# ---------------------------------------------------------------------------
def _linear_kernel(x_ref, w_ref, b_ref, o_ref, acc_ref):
    @pl.when(pl.program_id(2) == 0)
    def _():
        acc_ref[...] = jnp.zeros(acc_ref.shape, jnp.float32)

    # bf16 x bf16 -> f32 accumulate: native MXU path on v5e/v6e/v7x.
    acc_ref[...] += jnp.dot(x_ref[...], w_ref[...],
                            preferred_element_type=jnp.float32)

    @pl.when(pl.program_id(2) == pl.num_programs(2) - 1)
    def _():
        o_ref[...] = (acc_ref[...] + b_ref[...]).astype(o_ref.dtype)


def linear(x2d, w, b, *, out_dtype=jnp.float32, tm=512, tn=512, tk=512):
    """x2d: (M, E), w: (E, D), b: (D,) -> (M, D), tiled & pipelined."""
    M, E = x2d.shape
    D = w.shape[1]
    tm = _fit_tile(M, tm, 8)
    tn = _fit_tile(D, min(D, tn), 128)   # full D when D <= tn (fewer W re-reads)
    tk = _fit_tile(E, tk, 128)

    # Cast to bf16 at the call boundary: halves HBM+VMEM traffic for the
    # DMA'd blocks.  Bias and accumulator stay f32.
    xb = x2d.astype(jnp.bfloat16)
    wb = w.astype(jnp.bfloat16)
    b2d = b.reshape(1, D).astype(jnp.float32)

    cost = pl.CostEstimate(
        flops=2 * M * D * E,
        transcendentals=0,
        bytes_accessed=(M * E + (M // tm) * E * D) * 2
        + M * D * jnp.dtype(out_dtype).itemsize + D * 4,
    )
    return pl.pallas_call(
        _linear_kernel,
        out_shape=jax.ShapeDtypeStruct((M, D), out_dtype),
        grid_spec=pltpu.PrefetchScalarGridSpec(
            num_scalar_prefetch=0,
            grid=(M // tm, D // tn, E // tk),
            in_specs=[
                pl.BlockSpec((tm, tk), lambda i, j, k: (i, k)),
                pl.BlockSpec((tk, tn), lambda i, j, k: (k, j)),
                pl.BlockSpec((1, tn), lambda i, j, k: (0, j)),
            ],
            out_specs=pl.BlockSpec((tm, tn), lambda i, j, k: (i, j)),
            scratch_shapes=[pltpu.VMEM((tm, tn), jnp.float32)],
        ),
        compiler_params=pltpu.CompilerParams(
            dimension_semantics=("parallel", "parallel", "arbitrary"),
            vmem_limit_bytes=_VMEM_LIMIT),
        cost_estimate=cost,
    )(xb, wb, b2d)


# ---------------------------------------------------------------------------
# Flash attention, heads batched per step, K/V pre-laid per head in HBM
# ---------------------------------------------------------------------------
def _attn_kernel(q_ref, k_ref, v_ref, o_ref, q_sc, m_sc, l_sc, acc_sc,
                 *, num_heads, head_dim):
    kv = pl.program_id(2)
    H, d = num_heads, head_dim
    tq = q_ref.shape[1]

    @pl.when(kv == 0)
    def _():
        # Head-split q ONCE per (q-tile, batch); reused for every kv step.
        q_sc[...] = jnp.transpose(q_ref[0].reshape(tq, H, d),
                                  (1, 0, 2)).astype(q_sc.dtype)
        m_sc[...] = jnp.full(m_sc.shape, -jnp.inf, jnp.float32)
        l_sc[...] = jnp.zeros(l_sc.shape, jnp.float32)
        acc_sc[...] = jnp.zeros(acc_sc.shape, jnp.float32)

    k = k_ref[0]                      # (H, d, tkv) bf16 — feeds QK^T directly
    v = v_ref[0]                      # (H, tkv, d) bf16

    # q was pre-scaled by 1/sqrt(d) (folded into the q projection weights).
    # bf16 MXU matmul, f32 accumulation.
    s = jnp.einsum("hqd,hdk->hqk", q_sc[...], k,
                   preferred_element_type=jnp.float32)        # (H, tq, tkv)

    m_prev = m_sc[...]
    m_new = jnp.maximum(m_prev, jnp.max(s, axis=-1, keepdims=True))
    alpha = jnp.exp(m_prev - m_new)
    p = jnp.exp(s - m_new)                                    # (H, tq, tkv) f32
    l_sc[...] = alpha * l_sc[...] + jnp.sum(p, axis=-1, keepdims=True)
    acc_sc[...] = alpha * acc_sc[...] + jnp.einsum(
        "hqk,hkd->hqd", p.astype(jnp.bfloat16), v,            # bf16 PV matmul
        preferred_element_type=jnp.float32)
    m_sc[...] = m_new

    @pl.when(kv == pl.num_programs(2) - 1)
    def _():
        inv_l = pl.reciprocal(l_sc[...], approx=True)         # EUP slot
        out = acc_sc[...] * inv_l                             # (H, tq, d)
        # Recombine heads in-register -> lane-dense (tq, H*d) single store.
        out = jnp.swapaxes(out, 0, 1).reshape(tq, H * d)
        o_ref[0] = out.astype(o_ref.dtype)


def multihead_attention(qp, k_t, v_t, num_heads, head_dim,
                        *, tq_target=256, tkv_target=256):
    """qp: (B, Nq, H*d) bf16 (pre-scaled q), k_t: (B, H, d, Nk) bf16,
    v_t: (B, H, Nk, d) bf16 -> (B, Nq, H*d) bf16."""
    B, Nq, HD = qp.shape
    Nk = k_t.shape[-1]
    H, d = num_heads, head_dim
    tq = _fit_tile(Nq, tq_target, 128)     # 128-aligned -> full MXU passes
    tkv = _fit_tile(Nk, tkv_target, 128)   # lane dim of s/p, PV contraction
    n_q, n_kv = Nq // tq, Nk // tkv

    kernel = functools.partial(_attn_kernel, num_heads=H, head_dim=d)
    itemsize = jnp.dtype(qp.dtype).itemsize
    cost = pl.CostEstimate(
        flops=4 * B * H * Nq * Nk * d,
        transcendentals=B * H * Nq * Nk,
        bytes_accessed=(2 * qp.size + n_q * (k_t.size + v_t.size)) * itemsize,
    )
    return pl.pallas_call(
        kernel,
        out_shape=jax.ShapeDtypeStruct((B, Nq, HD), qp.dtype),
        grid_spec=pltpu.PrefetchScalarGridSpec(
            num_scalar_prefetch=0,
            # q-tile axis leads so v7x megacore sharding stays balanced when B
            # is small; kv axis is innermost ('arbitrary', accumulators live).
            grid=(n_q, B, n_kv),
            in_specs=[
                pl.BlockSpec((1, tq, HD), lambda qi, b, kt: (b, qi, 0)),
                pl.BlockSpec((1, H, d, tkv), lambda qi, b, kt: (b, 0, 0, kt)),
                pl.BlockSpec((1, H, tkv, d), lambda qi, b, kt: (b, 0, kt, 0)),
            ],
            out_specs=pl.BlockSpec((1, tq, HD), lambda qi, b, kt: (b, qi, 0)),
            scratch_shapes=[
                pltpu.VMEM((H, tq, d), jnp.bfloat16),   # cached head-split q
                pltpu.VMEM((H, tq, 1), jnp.float32),    # running max
                pltpu.VMEM((H, tq, 1), jnp.float32),    # running sum
                pltpu.VMEM((H, tq, d), jnp.float32),    # running accumulator
            ],
        ),
        compiler_params=pltpu.CompilerParams(
            dimension_semantics=("parallel", "parallel", "arbitrary"),
            vmem_limit_bytes=_VMEM_LIMIT),
        cost_estimate=cost,
    )(qp, k_t, v_t)


# ---------------------------------------------------------------------------
# Module wrapper (parameter container + forward, mirroring the PyTorch module)
# ---------------------------------------------------------------------------
class AttentionPallas:
    def __init__(self, embedding_dim, num_heads, downsample_rate=1, key=None):
        self.embedding_dim = embedding_dim
        self.internal_dim = embedding_dim // downsample_rate
        self.num_heads = num_heads
        assert self.internal_dim % num_heads == 0, "num_heads must divide embedding_dim."
        self.head_dim = self.internal_dim // num_heads

        if key is None:
            key = jax.random.PRNGKey(0)
        ks = jax.random.split(key, 8)

        def init_linear(kw, kb, in_dim, out_dim):
            # nn.Linear default init: U(-1/sqrt(in), 1/sqrt(in)); W stored as
            # (in_dim, out_dim) so kernels compute x @ W directly.
            bound = 1.0 / math.sqrt(in_dim)
            w = jax.random.uniform(kw, (in_dim, out_dim), jnp.float32, -bound, bound)
            b = jax.random.uniform(kb, (out_dim,), jnp.float32, -bound, bound)
            return w, b

        self.q_w, self.q_b = init_linear(ks[0], ks[1], embedding_dim, self.internal_dim)
        self.k_w, self.k_b = init_linear(ks[2], ks[3], embedding_dim, self.internal_dim)
        self.v_w, self.v_b = init_linear(ks[4], ks[5], embedding_dim, self.internal_dim)
        self.o_w, self.o_b = init_linear(ks[6], ks[7], self.internal_dim, embedding_dim)

        # Fold the 1/sqrt(d) attention scale into the q projection so the
        # attention kernel never multiplies the (tq, tkv) score slab.
        scale = 1.0 / math.sqrt(self.head_dim)
        self.q_w_scaled = self.q_w * scale
        self.q_b_scaled = self.q_b * scale

        # Fused K/V projection weights for the common k-is-v case: halves HBM
        # reads of the kv source and removes one pallas_call launch.
        self.kv_w = jnp.concatenate([self.k_w, self.v_w], axis=1)
        self.kv_b = jnp.concatenate([self.k_b, self.v_b], axis=0)

    def __call__(self, q, k, v):
        B, Nq, E = q.shape
        Nk = k.shape[1]
        ID, H, d = self.internal_dim, self.num_heads, self.head_dim

        # Projections run in bf16 on the MXU (f32 accumulate) and emit bf16
        # activations straight into the attention kernel.
        qp = linear(q.reshape(B * Nq, E), self.q_w_scaled, self.q_b_scaled,
                    out_dtype=jnp.bfloat16).reshape(B, Nq, ID)
        if k is v:
            kvp = linear(k.reshape(B * Nk, E), self.kv_w, self.kv_b,
                         out_dtype=jnp.bfloat16)
            kp, vp = kvp[:, :ID], kvp[:, ID:]
        else:
            kp = linear(k.reshape(B * Nk, E), self.k_w, self.k_b,
                        out_dtype=jnp.bfloat16)
            vp = linear(v.reshape(B * Nk, E), self.v_w, self.v_b,
                        out_dtype=jnp.bfloat16)

        # One-time HBM relayout so the attention inner loop never re-splits
        # heads: K -> (B, H, d, Nk) (lane-dense along Nk, feeds QK^T directly),
        # V -> (B, H, Nk, d).
        k_t = jnp.transpose(kp.reshape(B, Nk, H, d), (0, 2, 3, 1))
        v_t = jnp.transpose(vp.reshape(B, Nk, H, d), (0, 2, 1, 3))

        # Kernel output is already in the recombined (B, Nq, H*d) layout.
        oh = multihead_attention(qp, k_t, v_t, H, d)

        out = linear(oh.reshape(B * Nq, ID), self.o_w, self.o_b,
                     out_dtype=jnp.float32)
        return out.reshape(B, Nq, E)


# ---------------------------------------------------------------------------
# Pure-JAX reference (mirrors the PyTorch forward exactly, in f32)
# ---------------------------------------------------------------------------
def reference_forward(mod: AttentionPallas, q, k, v):
    def lin(x, w, b):
        return x @ w + b

    def sep(x):
        b, n, c = x.shape
        x = x.reshape(b, n, mod.num_heads, c // mod.num_heads)
        return jnp.transpose(x, (0, 2, 1, 3))

    qp, kp, vp = lin(q, mod.q_w, mod.q_b), lin(k, mod.k_w, mod.k_b), lin(v, mod.v_w, mod.v_b)
    qh, kh, vh = sep(qp), sep(kp), sep(vp)
    d = qh.shape[-1]
    attn = jnp.einsum("bhqd,bhkd->bhqk", qh, kh) / math.sqrt(d)
    attn = jax.nn.softmax(attn, axis=-1)
    oh = jnp.einsum("bhqk,bhkd->bhqd", attn, vh)
    b, h, n, dd = oh.shape
    o = jnp.transpose(oh, (0, 2, 1, 3)).reshape(b, n, h * dd)
    return lin(o, mod.o_w, mod.o_b)


# ---------------------------------------------------------------------------
# Main
# ---------------------------------------------------------------------------
if __name__ == "__main__":
    B = 2          # batch
    Nq = 8         # query tokens
    Nk = 8         # key/value tokens
    E = 32         # embedding_dim
    H = 4          # num_heads
    DS = 1         # downsample_rate

    key = jax.random.PRNGKey(0)
    kq, kk, kv_, kparams = jax.random.split(key, 4)
    q = jax.random.normal(kq, (B, Nq, E), jnp.float32)
    k = jax.random.normal(kk, (B, Nk, E), jnp.float32)
    v = jax.random.normal(kv_, (B, Nk, E), jnp.float32)

    mod = AttentionPallas(E, H, DS, key=kparams)

    out = jax.block_until_ready(mod(q, k, v))

    ref = reference_forward(mod, q, k, v)
    # Tolerance covers bf16 MXU inputs (f32 accumulation) and the approx
    # (EUP) reciprocal in the softmax normalizer.
    np.testing.assert_allclose(np.asarray(out), np.asarray(ref), rtol=3e-2, atol=3e-2)

    print("KERNEL_OK")
</pallas_src>

<mosaic_0001>
module attributes {stable_mosaic.version = 11 : i64} {
  func.func @_linear_kernel(%arg0: i32, %arg1: i32, %arg2: i32, %arg3: memref<16x32xbf16, #tpu.memory_space<vmem>>, %arg4: memref<32x32xbf16, #tpu.memory_space<vmem>>, %arg5: memref<1x32xf32, #tpu.memory_space<vmem>>, %arg6: memref<16x32xbf16, #tpu.memory_space<vmem>>, %arg7: memref<16x32xf32, #tpu.memory_space<vmem>>) attributes {dimension_semantics = [#tpu.dimension_semantics<parallel>, #tpu.dimension_semantics<parallel>, #tpu.dimension_semantics<arbitrary>], iteration_bounds = array<i64: 1, 1, 1>, scalar_prefetch = 0 : i64, scratch_operands = 1 : i64, tpu.core_type = #tpu.core_type<tc>, window_params = [{transform_indices = @transform_0, window_bounds = array<i64: 16, 32>}, {transform_indices = @transform_1, window_bounds = array<i64: 32, 32>}, {transform_indices = @transform_2, window_bounds = array<i64: 1, 32>}, {transform_indices = @transform_3, window_bounds = array<i64: 16, 32>}]} {
    %c0_i32 = arith.constant 0 : i32
    %0 = arith.cmpi eq, %arg2, %c0_i32 : i32
    %1 = arith.extui %0 : i1 to i32
    %c0_i32_0 = arith.constant 0 : i32
    %2 = arith.cmpi ne, %1, %c0_i32_0 : i32
    scf.if %2 {
      %cst_10 = arith.constant 0.000000e+00 : f32
      %12 = vector.broadcast %cst_10 : f32 to vector<16x32xf32>
      %c0_11 = arith.constant 0 : index
      %c0_12 = arith.constant 0 : index
      %13 = vector.load %arg7[%c0_11, %c0_12] : memref<16x32xf32, #tpu.memory_space<vmem>>, vector<16x32xf32>
      tpu.vector_store %arg7[%c0_11, %c0_12], %12 {strides = array<i32>} : memref<16x32xf32, #tpu.memory_space<vmem>>, vector<16x32xf32>,
    } else {
    }
    %c0 = arith.constant 0 : index
    %c0_1 = arith.constant 0 : index
    %3 = vector.load %arg7[%c0, %c0_1] : memref<16x32xf32, #tpu.memory_space<vmem>>, vector<16x32xf32>
    %c0_2 = arith.constant 0 : index
    %c0_3 = arith.constant 0 : index
    %4 = vector.load %arg3[%c0_2, %c0_3] : memref<16x32xbf16, #tpu.memory_space<vmem>>, vector<16x32xbf16>
    %c0_4 = arith.constant 0 : index
    %c0_5 = arith.constant 0 : index
    %5 = vector.load %arg4[%c0_4, %c0_5] : memref<32x32xbf16, #tpu.memory_space<vmem>>, vector<32x32xbf16>
    %cst = arith.constant dense<0.000000e+00> : vector<16x32xf32>
    %6 = tpu.matmul %4, %5, %cst {dimension_numbers = #tpu.dot_dimension_numbers<[1], [0], [0], [1], [0, 0, 1, 1], [], []>} : vector<16x32xbf16>, vector<32x32xbf16>, vector<16x32xf32> -> vector<16x32xf32>
    %7 = arith.addf %3, %6 : vector<16x32xf32>
    %c0_6 = arith.constant 0 : index
    %c0_7 = arith.constant 0 : index
    %8 = vector.load %arg7[%c0_6, %c0_7] : memref<16x32xf32, #tpu.memory_space<vmem>>, vector<16x32xf32>
    tpu.vector_store %arg7[%c0_6, %c0_7], %7 {strides = array<i32>} : memref<16x32xf32, #tpu.memory_space<vmem>>, vector<16x32xf32>,
    %c0_i32_8 = arith.constant 0 : i32
    %9 = arith.cmpi eq, %arg2, %c0_i32_8 : i32
    %10 = arith.extui %9 : i1 to i32
    %c0_i32_9 = arith.constant 0 : i32
    %11 = arith.cmpi ne, %10, %c0_i32_9 : i32
    scf.if %11 {
      %c0_10 = arith.constant 0 : index
      %c0_11 = arith.constant 0 : index
      %12 = vector.load %arg7[%c0_10, %c0_11] : memref<16x32xf32, #tpu.memory_space<vmem>>, vector<16x32xf32>
      %c0_12 = arith.constant 0 : index
      %c0_13 = arith.constant 0 : index
      %13 = vector.load %arg5[%c0_12, %c0_13] : memref<1x32xf32, #tpu.memory_space<vmem>>, vector<1x32xf32>
      %14 = vector.broadcast %13 : vector<1x32xf32> to vector<16x32xf32>
      %15 = arith.addf %12, %14 : vector<16x32xf32>
      %16 = arith.truncf %15 : vector<16x32xf32> to vector<16x32xbf16>
      %c0_14 = arith.constant 0 : index
      %c0_15 = arith.constant 0 : index
      %17 = vector.load %arg6[%c0_14, %c0_15] : memref<16x32xbf16, #tpu.memory_space<vmem>>, vector<16x32xbf16>
      tpu.vector_store %arg6[%c0_14, %c0_15], %16 {strides = array<i32>} : memref<16x32xbf16, #tpu.memory_space<vmem>>, vector<16x32xbf16>,
    } else {
    }
    return
  }
  func.func @transform_0(%arg0: i32, %arg1: i32, %arg2: i32) -> (i32, i32) {
    %c0_i32 = arith.constant 0 : i32
    return %arg0, %arg2 : i32, i32
  }
  func.func @transform_1(%arg0: i32, %arg1: i32, %arg2: i32) -> (i32, i32) {
    %c0_i32 = arith.constant 0 : i32
    return %arg2, %arg1 : i32, i32
  }
  func.func @transform_2(%arg0: i32, %arg1: i32, %arg2: i32) -> (i32, i32) {
    %c0_i32 = arith.constant 0 : i32
    %c0_i32_0 = arith.constant 0 : i32
    return %c0_i32, %arg1 : i32, i32
  }
  func.func @transform_3(%arg0: i32, %arg1: i32, %arg2: i32) -> (i32, i32) {
    %c0_i32 = arith.constant 0 : i32
    return %arg0, %arg1 : i32, i32
  }
}

</mosaic_0001>

<bundles_post_ra>
// kernel: tpu_custom_call.1
= control target key start
LH: loop header
LB: loop body
LE: loop exit
PB: predicated region body
PF: predicated region fallthrough
CT: control target
= control target key end

     0   :  { %8 = vsyncpa [#allocation4], 0  ;;  %s350_s0 = inlined_call_operand.hbm [shape: bf16[16,32], index: 0, kind: input, shape index: {}]   ;;  %s351_s1 = inlined_call_operand.hbm [shape: bf16[32,32], index: 1, kind: input, shape index: {}]   ;;  %s352_s2 = inlined_call_operand.vmem [shape: f32[1,32], index: 2, kind: input, shape index: {}]   ;;  %s353_s3 = inlined_call_operand.hbm [shape: bf16[16,32], index: 3, kind: output, shape index: {}]  }
   0x1   :  { %9 = vsyncpa [#allocation7], 0 }
   0x2   :  { %10 = vsyncpa [#allocation5], 0  ;;  %s270_s12 = smov [#allocation3]   ;;  %s198_s16 = scalar_lea.hbm %s350_s0, 128 }
   0x3   :  { %s16_s13 = sshll.u32 %s270_s12, 4  ;;  %p199_p0 = scmp.ne.s32.totalorder %s350_s0, %s198_s16  ;;  %s17_s13 = int_to_ptr.vmem [resolvable:$true] %s16_s13 }
   0x4   :  { %p202_p1 = scmp.lt.u32.totalorder %s198_s16, %s350_s0 }
   0x6   :  { %p204_p2 = pnand %p202_p1, %p199_p0 }
   0x8   :  { %207 = shalt.err (!%p204_p2)
}
   0x9   :  { %s208_s21 = scalar_lea.vmem %s17_s13, 128  ;;  %p213_p4 = scmp.lt.s32.totalorder %s17_s13, %s17_s13 }
   0xa   :  { %p209_p3 = scmp.ne.s32.totalorder %s17_s13, %s208_s21  ;;  %p214_p5 = scmp.lt.s32.totalorder %s208_s21, %s208_s21 }
   0xc   :  { %p215_p6 = por %p214_p5, %p213_p4 }
   0xe   :  { %p216_p7 = pnand %p215_p6, %p209_p3 }
  0x10   :  { %219 = shalt.err (!%p216_p7)
}
  0x11   :  { %s271_s22 = smov 64   ;;  %s272_s23 = smov 4  }
  0x12   :  { %22 = dma.hbm_to_vmem [thread:$0]  %s350_s0, 128, %s17_s13, [#allocation4], %s271_s22, %s271_s22, %s272_s23  }
  0x13   :  { %s273_s26 = smov [#allocation6]   ;;  %s220_s30 = scalar_lea.hbm %s351_s1, 256 }
  0x14   :  { %s28_s27 = sshll.u32 %s273_s26, 4  ;;  %p221_p8 = scmp.ne.s32.totalorder %s351_s1, %s220_s30  ;;  %s29_s27 = int_to_ptr.vmem [resolvable:$true] %s28_s27 }
  0x15   :  { %p224_p9 = scmp.lt.u32.totalorder %s220_s30, %s351_s1 }
  0x17   :  { %p226_p10 = pnand %p224_p9, %p221_p8 }
  0x19   :  { %229 = shalt.err (!%p226_p10)
}
  0x1a   :  { %s230_s8 = scalar_lea.vmem %s29_s27, 256  ;;  %p235_p12 = scmp.lt.s32.totalorder %s29_s27, %s29_s27 }
  0x1b   :  { %p231_p11 = scmp.ne.s32.totalorder %s29_s27, %s230_s8  ;;  %p236_p13 = scmp.lt.s32.totalorder %s230_s8, %s230_s8 }
  0x1d   :  { %p237_p0 = por %p236_p13, %p235_p12 }
  0x1f   :  { %p238_p1 = pnand %p237_p0, %p231_p11 }
  0x21   :  { %241 = shalt.err (!%p238_p1)
}
  0x22   :  { %34 = dma.hbm_to_vmem [thread:$0]  %s351_s1, 256, %s29_s27, [#allocation7], %s271_s22, %s271_s22, %s272_s23  }
  0x23   :  { %264 = dma.done.wait [#allocation4], 128  }
  0x24   :  { %265 = vsyncadd [#allocation4], 4294967168 }
  0x25   :  { %266 = dma.done.wait [#allocation7], 256  }
  0x26   :  { %267 = vsyncadd [#allocation7], 4294967040  ;;  %vm48_vm0 = vcmask 261120   ;;  %v274_v0 = vmov 0.0   ;;  %vm275_vm1 = vmmov 0   ;;  %v195_v1 = vld [vmem:[#allocation6] sm:$0xff]  }
  0x27   :  { %180 = vmatprep.subr.bf16.mxu0 %v274_v0  ;;  %184 = vmatprep.mubr.msk.bf16.mxu0 %vm275_vm1, %v274_v0  ;;  %49 = vst.msk [vmem:[#allocation2] sm:$0xff] %vm48_vm0, %v274_v0  ;;  %50 = vst.msk [vmem:[#allocation2 + $0x8] sm:$0xff] %vm48_vm0, %v274_v0  ;;  %v196_v2 = vld [vmem:[#allocation6 + $0x8] sm:$0xff]   ;;  %v197_v3 = vld [vmem:[#allocation3] sm:$0xff]   ;;  %vm147_vm2 = vcmask 257024   ;;  %s276_s11 = smov [#allocation8]  }
  0x28   :  { %181 = vmatpush3.bf16.msra.mxu0 %v195_v1  ;;  %v172_v12 = vld [vmem:[%s352_s2] ss:$0 sm:$0xff]  ;;  %s155_s12 = sshll.u32 %s276_s11, 4  ;;  %s156_s12 = int_to_ptr.vmem [resolvable:$true] %s155_s12 }
  0x29   :  { %182 = vmatprep.subr.bf16.mxu0 %v274_v0  ;;  %s242_s13 = scalar_lea.vmem %s156_s12, 128  ;;  %p247_p3 = scmp.lt.s32.totalorder %s156_s12, %s156_s12 }
  0x2a   :  { %p243_p2 = scmp.ne.s32.totalorder %s156_s12, %s242_s13  ;;  %p248_p4 = scmp.lt.s32.totalorder %s242_s13, %s242_s13 }
  0x2c   :  { %183 = vmatpush3.bf16.msra.mxu0 %v196_v2  ;;  %p249_p5 = por %p248_p4, %p247_p3 }
  0x2e   :  { %v51_v4 = vld [vmem:[#allocation2] sm:$0xff]  ;;  %v52_v6 = vld [vmem:[#allocation2 + $0x8] sm:$0xff]  ;;  %p250_p6 = pnand %p249_p5, %p243_p2 }
  0x2f   :  { %185 = vmatmul.mubr.msk.bf16.vlgmr.msra.gmra.mrb[0].mxu0 %vm48_vm0, %v197_v3 }
 0x102   :  { %v114_v5 = vpop.f32.mrb[0].mxu0 }
 0x103   :  { %v121_v7 = vadd.f32 %v114_v5, %v51_v4  ;;  %v186_v8 = vpop.f32.mrb[1].mxu0 }
 0x104   :  { %v117_v9 = vpop.f32.mrb[2].mxu0 }
 0x105   :  { %123 = vst.msk [vmem:[#allocation2] sm:$0xff] %vm48_vm0, %v121_v7  ;;  %v122_v10 = vadd.f32 %v117_v9, %v52_v6  ;;  %v187_v11 = vpop.f32.mrb[3].mxu0 }
 0x107   :  { %124 = vst.msk [vmem:[#allocation2 + $0x8] sm:$0xff] %vm48_vm0, %v122_v10 }
 0x10c   :  { %v128_v13 = vld [vmem:[#allocation2] sm:$0xff] }
 0x10d   :  { %v137_v14 = vadd.f32 %v172_v12, %v128_v13 }
 0x10e   :  { %v129_v15 = vld [vmem:[#allocation2 + $0x8] sm:$0xff] }
 0x10f   :  { %v138_v16 = vadd.f32 %v172_v12, %v129_v15  ;;  %v175_v17 = vpack.c.bf16 %v137_v14, %v137_v14 }
 0x111   :  { %v176_v18 = vpack.c.bf16 %v138_v16, %v138_v16  ;;  %148 = vst.msk [vmem:[#allocation8] sm:$0xf] %vm147_vm2, %v175_v17 }
 0x113   :  { %149 = vst.msk [vmem:[#allocation8 + $0x4] sm:$0xf] %vm147_vm2, %v176_v18 }
 0x114   :  { %253 = shalt.err (!%p250_p6)
}
 0x115   :  { %s254_s15 = scalar_lea.hbm %s353_s3, 128 }
 0x116   :  { %p255_p7 = scmp.ne.s32.totalorder %s353_s3, %s254_s15  ;;  %p258_p8 = scmp.lt.u32.totalorder %s254_s15, %s353_s3 }
 0x118   :  { %p260_p9 = pnand %p258_p8, %p255_p7 }
 0x11a   :  { %263 = shalt.err (!%p260_p9)
}
 0x11b   :  { %161 = dma.vmem_to_hbm [thread:$0]  %s156_s12, 128, %s353_s3, [#allocation5], %s271_s22, %s271_s22, %s272_s23  }
 0x11c   :  { %268 = dma.done.wait [#allocation5], 128  }
 0x11d   :  { %269 = vsyncadd [#allocation5], 4294967168 }
 0x11e   :  { %165 = vsyncpa [#allocation4], 1 }
 0x11f   :  { %166 = vsyncpa [#allocation7], 1 }
 0x120   :  { %167 = vsyncpa [#allocation5], 1 }

</bundles_post_ra>
